<compile_context>
chip_gen: v6e
topology: v6e:2x2x1
jax: 0.10.0
libtpu: 0.0.40
codegen_flags: <defaults>
</compile_context>

<pallas_src>
import jax
import jax.numpy as jnp
from jax import lax
from jax.experimental import pallas as pl
from jax.experimental.pallas import tpu as pltpu

NEG_SLOPE = 0.2
LANE = 128


def _leaky_relu(x):
    return jnp.where(x >= 0, x, NEG_SLOPE * x)


def mine1_kernel(x_ref, w1_ref, b1_ref, w2_ref, b2_ref, w3_ref, b3_ref, out_ref):
    # x_ref : (TB, Kp)   fused [noise | sample] rows (zero-padded to lane mult)
    # w1_ref: (Kp, H)    fused [W1n.T ; W1s.T]   (zero-padded rows)
    # b1_ref: (1, H)
    # w2_ref: (H, H)     fc2 weight, transposed to (in, out)
    # b2_ref: (1, H)
    # w3_ref: (H, 128)   fc3 weight.T zero-padded to 128 output lanes
    # b3_ref: (1, 128)   fc3 bias zero-padded
    # out   : (TB, 128)  lane-dense output slab; real fc3 output is column 0
    h = jnp.dot(x_ref[...], w1_ref[...], preferred_element_type=jnp.float32)
    h = _leaky_relu(h + b1_ref[...])
    h = jnp.dot(h, w2_ref[...], preferred_element_type=jnp.float32)
    h = _leaky_relu(h + b2_ref[...])
    y = jnp.dot(h, w3_ref[...], preferred_element_type=jnp.float32)
    out_ref[...] = _leaky_relu(y + b3_ref[...])


def mine1_forward(noise, sample, params, *, block_b=128):
    """noise: (B, noise_size), sample: (B, sample_size).
    params (torch-shaped): w1n (H,Kn), w1s (H,Ks), b1 (H,), w2 (H,H), b2 (H,),
                           w3 (O,H), b3 (O,)."""
    w1n, w1s, b1, w2, b2, w3, b3 = params
    B = noise.shape[0]
    H = w1n.shape[0]
    O = w3.shape[0]

    # --- fuse the two fc1 matmuls into one big-K matmul (wrapper-side, XLA) ---
    xin = jnp.concatenate([noise, sample], axis=1).astype(jnp.float32)      # (B, K)
    w1 = jnp.concatenate([w1n.T, w1s.T], axis=0).astype(jnp.float32)        # (K, H)
    K = xin.shape[1]

    # --- pad to TPU-friendly tiles (zero padding is numerically exact) ---
    Kp = pl.cdiv(K, LANE) * LANE
    TB = min(block_b, max(8, pl.cdiv(B, 8) * 8))
    Bp = pl.cdiv(B, TB) * TB
    Op = LANE                                  # lane-dense output slab width

    xin = jnp.pad(xin, ((0, Bp - B), (0, Kp - K)))
    w1 = jnp.pad(w1, ((0, Kp - K), (0, 0)))
    w3p = jnp.pad(w3.T.astype(jnp.float32), ((0, 0), (0, Op - O)))          # (H, 128)
    b3p = jnp.pad(b3.astype(jnp.float32), (0, Op - O)).reshape(1, Op)

    out = pl.pallas_call(
        mine1_kernel,
        out_shape=jax.ShapeDtypeStruct((Bp, Op), jnp.float32),
        grid_spec=pltpu.PrefetchScalarGridSpec(
            num_scalar_prefetch=0,
            grid=(Bp // TB,),
            in_specs=[
                pl.BlockSpec((TB, Kp), lambda i: (i, 0)),   # batch-tiled input
                pl.BlockSpec((Kp, H), lambda i: (0, 0)),    # weights stay resident
                pl.BlockSpec((1, H), lambda i: (0, 0)),
                pl.BlockSpec((H, H), lambda i: (0, 0)),
                pl.BlockSpec((1, H), lambda i: (0, 0)),
                pl.BlockSpec((H, Op), lambda i: (0, 0)),
                pl.BlockSpec((1, Op), lambda i: (0, 0)),
            ],
            out_specs=pl.BlockSpec((TB, Op), lambda i: (i, 0)),
        ),
        compiler_params=pltpu.CompilerParams(
            dimension_semantics=("parallel",)),
    )(xin, w1,
      b1.reshape(1, H).astype(jnp.float32),
      jnp.transpose(w2).astype(jnp.float32),
      b2.reshape(1, H).astype(jnp.float32),
      w3p, b3p)

    return out[:B, :O]                          # drop batch padding + lane padding


def reference(noise, sample, params):
    """Pure-JAX reference matching the PyTorch forward."""
    w1n, w1s, b1, w2, b2, w3, b3 = params
    hp = lax.Precision.HIGHEST
    x = (jnp.dot(noise, w1n.T, precision=hp)
         + jnp.dot(sample, w1s.T, precision=hp) + b1)
    x = jnp.where(x >= 0, x, NEG_SLOPE * x)
    x = jnp.dot(x, w2.T, precision=hp) + b2
    x = jnp.where(x >= 0, x, NEG_SLOPE * x)
    x = jnp.dot(x, w3.T, precision=hp) + b3
    x = jnp.where(x >= 0, x, NEG_SLOPE * x)
    return x


if __name__ == "__main__":
    key = jax.random.PRNGKey(0)
    B = 8
    noise_size, sample_size, hidden, out_size = 49, 28 * 28, 128, 1

    ks = jax.random.split(key, 9)
    noise = jax.random.normal(ks[0], (B, noise_size), jnp.float32)
    sample = jax.random.normal(ks[1], (B, sample_size), jnp.float32)

    # Kaiming-normal-style init (deterministic, no checkpoint loading).
    w1n = jax.random.normal(ks[2], (hidden, noise_size), jnp.float32) * jnp.sqrt(2.0 / noise_size)
    w1s = jax.random.normal(ks[3], (hidden, sample_size), jnp.float32) * jnp.sqrt(2.0 / sample_size)
    b1 = jnp.zeros((hidden,), jnp.float32)
    w2 = jax.random.normal(ks[4], (hidden, hidden), jnp.float32) * jnp.sqrt(2.0 / hidden)
    b2 = jnp.zeros((hidden,), jnp.float32)
    w3 = jax.random.normal(ks[5], (out_size, hidden), jnp.float32) * jnp.sqrt(2.0 / hidden)
    b3 = jnp.zeros((out_size,), jnp.float32)

    params = (w1n, w1s, b1, w2, b2, w3, b3)

    out = mine1_forward(noise, sample, params)
    out = jax.block_until_ready(out)

    ref = reference(noise, sample, params)
    assert out.shape == (B, out_size), out.shape
    assert jnp.allclose(out, ref, atol=1e-3, rtol=1e-3), \
        float(jnp.max(jnp.abs(out - ref)))
    print("KERNEL_OK")
</pallas_src>

<mosaic_0001>
module attributes {stable_mosaic.version = 11 : i64} {
  func.func @mine1_kernel(%arg0: i32, %arg1: memref<8x896xf32, #tpu.memory_space<vmem>>, %arg2: memref<896x128xf32, #tpu.memory_space<vmem>>, %arg3: memref<1x128xf32, #tpu.memory_space<vmem>>, %arg4: memref<128x128xf32, #tpu.memory_space<vmem>>, %arg5: memref<1x128xf32, #tpu.memory_space<vmem>>, %arg6: memref<128x128xf32, #tpu.memory_space<vmem>>, %arg7: memref<1x128xf32, #tpu.memory_space<vmem>>, %arg8: memref<8x128xf32, #tpu.memory_space<vmem>>) attributes {dimension_semantics = [#tpu.dimension_semantics<parallel>], iteration_bounds = array<i64: 1>, scalar_prefetch = 0 : i64, scratch_operands = 0 : i64, tpu.core_type = #tpu.core_type<tc>, window_params = [{transform_indices = @transform_0, window_bounds = array<i64: 8, 896>}, {pipeline_mode = #tpu.pipeline_mode<synchronous>, transform_indices = @transform_1, window_bounds = array<i64: 896, 128>}, {pipeline_mode = #tpu.pipeline_mode<synchronous>, transform_indices = @transform_2, window_bounds = array<i64: 1, 128>}, {pipeline_mode = #tpu.pipeline_mode<synchronous>, transform_indices = @transform_3, window_bounds = array<i64: 128, 128>}, {pipeline_mode = #tpu.pipeline_mode<synchronous>, transform_indices = @transform_4, window_bounds = array<i64: 1, 128>}, {pipeline_mode = #tpu.pipeline_mode<synchronous>, transform_indices = @transform_5, window_bounds = array<i64: 128, 128>}, {pipeline_mode = #tpu.pipeline_mode<synchronous>, transform_indices = @transform_6, window_bounds = array<i64: 1, 128>}, {transform_indices = @transform_7, window_bounds = array<i64: 8, 128>}]} {
    %c0 = arith.constant 0 : index
    %c0_0 = arith.constant 0 : index
    %0 = vector.load %arg1[%c0, %c0_0] : memref<8x896xf32, #tpu.memory_space<vmem>>, vector<8x896xf32>
    %c0_1 = arith.constant 0 : index
    %c0_2 = arith.constant 0 : index
    %1 = vector.load %arg2[%c0_1, %c0_2] : memref<896x128xf32, #tpu.memory_space<vmem>>, vector<896x128xf32>
    %cst = arith.constant dense<0.000000e+00> : vector<8x128xf32>
    %2 = tpu.matmul %0, %1, %cst {dimension_numbers = #tpu.dot_dimension_numbers<[1], [0], [0], [1], [0, 0, 1, 1], [], []>} : vector<8x896xf32>, vector<896x128xf32>, vector<8x128xf32> -> vector<8x128xf32>
    %c0_3 = arith.constant 0 : index
    %c0_4 = arith.constant 0 : index
    %3 = vector.load %arg3[%c0_3, %c0_4] : memref<1x128xf32, #tpu.memory_space<vmem>>, vector<1x128xf32>
    %4 = vector.broadcast %3 : vector<1x128xf32> to vector<8x128xf32>
    %5 = arith.addf %2, %4 : vector<8x128xf32>
    %cst_5 = arith.constant 0.000000e+00 : f32
    %6 = vector.broadcast %cst_5 : f32 to vector<8x128xf32>
    %7 = arith.cmpf oge, %5, %6 : vector<8x128xf32>
    %cst_6 = arith.constant 2.000000e-01 : f32
    %8 = vector.broadcast %cst_6 : f32 to vector<8x128xf32>
    %9 = arith.mulf %8, %5 : vector<8x128xf32>
    %10 = arith.select %7, %5, %9 : vector<8x128xi1>, vector<8x128xf32>
    %c0_7 = arith.constant 0 : index
    %c0_8 = arith.constant 0 : index
    %11 = vector.load %arg4[%c0_7, %c0_8] : memref<128x128xf32, #tpu.memory_space<vmem>>, vector<128x128xf32>
    %cst_9 = arith.constant dense<0.000000e+00> : vector<8x128xf32>
    %12 = tpu.matmul %10, %11, %cst_9 {dimension_numbers = #tpu.dot_dimension_numbers<[1], [0], [0], [1], [0, 0, 1, 1], [], []>} : vector<8x128xf32>, vector<128x128xf32>, vector<8x128xf32> -> vector<8x128xf32>
    %c0_10 = arith.constant 0 : index
    %c0_11 = arith.constant 0 : index
    %13 = vector.load %arg5[%c0_10, %c0_11] : memref<1x128xf32, #tpu.memory_space<vmem>>, vector<1x128xf32>
    %14 = vector.broadcast %13 : vector<1x128xf32> to vector<8x128xf32>
    %15 = arith.addf %12, %14 : vector<8x128xf32>
    %cst_12 = arith.constant 0.000000e+00 : f32
    %16 = vector.broadcast %cst_12 : f32 to vector<8x128xf32>
    %17 = arith.cmpf oge, %15, %16 : vector<8x128xf32>
    %cst_13 = arith.constant 2.000000e-01 : f32
    %18 = vector.broadcast %cst_13 : f32 to vector<8x128xf32>
    %19 = arith.mulf %18, %15 : vector<8x128xf32>
    %20 = arith.select %17, %15, %19 : vector<8x128xi1>, vector<8x128xf32>
    %c0_14 = arith.constant 0 : index
    %c0_15 = arith.constant 0 : index
    %21 = vector.load %arg6[%c0_14, %c0_15] : memref<128x128xf32, #tpu.memory_space<vmem>>, vector<128x128xf32>
    %cst_16 = arith.constant dense<0.000000e+00> : vector<8x128xf32>
    %22 = tpu.matmul %20, %21, %cst_16 {dimension_numbers = #tpu.dot_dimension_numbers<[1], [0], [0], [1], [0, 0, 1, 1], [], []>} : vector<8x128xf32>, vector<128x128xf32>, vector<8x128xf32> -> vector<8x128xf32>
    %c0_17 = arith.constant 0 : index
    %c0_18 = arith.constant 0 : index
    %23 = vector.load %arg7[%c0_17, %c0_18] : memref<1x128xf32, #tpu.memory_space<vmem>>, vector<1x128xf32>
    %24 = vector.broadcast %23 : vector<1x128xf32> to vector<8x128xf32>
    %25 = arith.addf %22, %24 : vector<8x128xf32>
    %cst_19 = arith.constant 0.000000e+00 : f32
    %26 = vector.broadcast %cst_19 : f32 to vector<8x128xf32>
    %27 = arith.cmpf oge, %25, %26 : vector<8x128xf32>
    %cst_20 = arith.constant 2.000000e-01 : f32
    %28 = vector.broadcast %cst_20 : f32 to vector<8x128xf32>
    %29 = arith.mulf %28, %25 : vector<8x128xf32>
    %30 = arith.select %27, %25, %29 : vector<8x128xi1>, vector<8x128xf32>
    %c0_21 = arith.constant 0 : index
    %c0_22 = arith.constant 0 : index
    %31 = vector.load %arg8[%c0_21, %c0_22] : memref<8x128xf32, #tpu.memory_space<vmem>>, vector<8x128xf32>
    tpu.vector_store %arg8[%c0_21, %c0_22], %30 {strides = array<i32>} : memref<8x128xf32, #tpu.memory_space<vmem>>, vector<8x128xf32>,
    return
  }
  func.func @transform_0(%arg0: i32) -> (i32, i32) {
    %c0_i32 = arith.constant 0 : i32
    %c0_i32_0 = arith.constant 0 : i32
    return %arg0, %c0_i32 : i32, i32
  }
  func.func @transform_1(%arg0: i32) -> (i32, i32) {
    %c0_i32 = arith.constant 0 : i32
    %c0_i32_0 = arith.constant 0 : i32
    %c0_i32_1 = arith.constant 0 : i32
    return %c0_i32, %c0_i32_0 : i32, i32
  }
  func.func @transform_2(%arg0: i32) -> (i32, i32) {
    %c0_i32 = arith.constant 0 : i32
    %c0_i32_0 = arith.constant 0 : i32
    %c0_i32_1 = arith.constant 0 : i32
    return %c0_i32, %c0_i32_0 : i32, i32
  }
  func.func @transform_3(%arg0: i32) -> (i32, i32) {
    %c0_i32 = arith.constant 0 : i32
    %c0_i32_0 = arith.constant 0 : i32
    %c0_i32_1 = arith.constant 0 : i32
    return %c0_i32, %c0_i32_0 : i32, i32
  }
  func.func @transform_4(%arg0: i32) -> (i32, i32) {
    %c0_i32 = arith.constant 0 : i32
    %c0_i32_0 = arith.constant 0 : i32
    %c0_i32_1 = arith.constant 0 : i32
    return %c0_i32, %c0_i32_0 : i32, i32
  }
  func.func @transform_5(%arg0: i32) -> (i32, i32) {
    %c0_i32 = arith.constant 0 : i32
    %c0_i32_0 = arith.constant 0 : i32
    %c0_i32_1 = arith.constant 0 : i32
    return %c0_i32, %c0_i32_0 : i32, i32
  }
  func.func @transform_6(%arg0: i32) -> (i32, i32) {
    %c0_i32 = arith.constant 0 : i32
    %c0_i32_0 = arith.constant 0 : i32
    %c0_i32_1 = arith.constant 0 : i32
    return %c0_i32, %c0_i32_0 : i32, i32
  }
  func.func @transform_7(%arg0: i32) -> (i32, i32) {
    %c0_i32 = arith.constant 0 : i32
    %c0_i32_0 = arith.constant 0 : i32
    return %arg0, %c0_i32 : i32, i32
  }
}

</mosaic_0001>

<bundles_post_ra>
// kernel: tpu_custom_call.1
= control target key start
LH: loop header
LB: loop body
LE: loop exit
PB: predicated region body
PF: predicated region fallthrough
CT: control target
= control target key end

     0   :  { %12 = vsyncpa [#allocation3], 0  ;;  %s1213_s0 = inlined_call_operand.hbm [shape: f32[8,896], index: 0, kind: input, shape index: {}]   ;;  %s1214_s1 = inlined_call_operand.hbm [shape: f32[896,128], index: 1, kind: input, shape index: {}]   ;;  %s1215_s2 = inlined_call_operand.vmem [shape: f32[1,128], index: 2, kind: input, shape index: {}]   ;;  %s1216_s3 = inlined_call_operand.hbm [shape: f32[128,128], index: 3, kind: input, shape index: {}]   ;;  %s1217_s4 = inlined_call_operand.vmem [shape: f32[1,128], index: 4, kind: input, shape index: {}]   ;;  %s1218_s5 = inlined_call_operand.hbm [shape: f32[128,128], index: 5, kind: input, shape index: {}]   ;;  %s1219_s6 = inlined_call_operand.vmem [shape: f32[1,128], index: 6, kind: input, shape index: {}]   ;;  %s1220_s7 = inlined_call_operand.hbm [shape: f32[8,128], index: 7, kind: output, shape index: {}]  }
   0x1   :  { %13 = vsyncpa [#allocation6], 0 }
   0x2   :  { %14 = vsyncpa [#allocation9], 0 }
   0x3   :  { %15 = vsyncpa [#allocation4], 0  ;;  %s1080_s24 = smov [#allocation5]  }
   0x4   :  { %s31_s25 = sshll.u32 %s1080_s24, 4  ;;  %s32_s25 = int_to_ptr.vmem [resolvable:$true] %s31_s25 }
   0x5   :  { %s980_s26 = scalar_lea.vmem %s32_s25, 14336  ;;  %p985_p1 = scmp.lt.s32.totalorder %s32_s25, %s32_s25 }
   0x6   :  { %p981_p0 = scmp.ne.s32.totalorder %s32_s25, %s980_s26  ;;  %p986_p2 = scmp.lt.s32.totalorder %s980_s26, %s980_s26 }
   0x8   :  { %p987_p3 = por %p986_p2, %p985_p1 }
   0xa   :  { %p988_p4 = pnand %p987_p3, %p981_p0 }
   0xc   :  { %991 = shalt.err (!%p988_p4)
}
   0xd   :  { %s1081_s27 = smov 128   ;;  %s1082_s28 = smov 8  }
   0xe   :  { %37 = dma.hbm_to_vmem [thread:$0]  %s1214_s1, 14336, %s32_s25, [#allocation6], %s1081_s27, %s1081_s27, %s1082_s28  }
   0xf   :  { %s1083_s8 = smov [#allocation2]   ;;  %s1084_s10 = smov [#allocation7]  }
  0x10   :  { %s22_s9 = sshll.u32 %s1083_s8, 4  ;;  %s45_s11 = sshll.u32 %s1084_s10, 4  ;;  %s23_s9 = int_to_ptr.vmem [resolvable:$true] %s22_s9  ;;  %s46_s11 = int_to_ptr.vmem [resolvable:$true] %s45_s11 }
  0x11   :  { %s1000_s12 = scalar_lea.vmem %s23_s9, 896  ;;  %p1005_p6 = scmp.lt.s32.totalorder %s23_s9, %s23_s9 }
  0x12   :  { %p1001_p5 = scmp.ne.s32.totalorder %s23_s9, %s1000_s12  ;;  %p1006_p7 = scmp.lt.s32.totalorder %s1000_s12, %s1000_s12 }
  0x14   :  { %p1007_p8 = por %p1006_p7, %p1005_p6 }
  0x16   :  { %p1008_p9 = pnand %p1007_p8, %p1001_p5 }
  0x18   :  { %1011 = shalt.err (!%p1008_p9)
}
  0x19   :  { %25 = dma.hbm_to_vmem [thread:$0]  %s1213_s0, 896, %s23_s9, [#allocation3]  }
  0x1a   :  { %s1020_s15 = scalar_lea.vmem %s46_s11, 2048  ;;  %p1025_p11 = scmp.lt.s32.totalorder %s46_s11, %s46_s11 }
  0x1b   :  { %p1021_p10 = scmp.ne.s32.totalorder %s46_s11, %s1020_s15  ;;  %p1026_p12 = scmp.lt.s32.totalorder %s1020_s15, %s1020_s15 }
  0x1d   :  { %p1027_p13 = por %p1026_p12, %p1025_p11 }
  0x1f   :  { %p1028_p0 = pnand %p1027_p13, %p1021_p10 }
  0x21   :  { %1031 = shalt.err (!%p1028_p0)
}
  0x22   :  { %51 = dma.hbm_to_vmem [thread:$0]  %s1216_s3, 2048, %s46_s11, [#allocation6], %s1081_s27, %s1081_s27, %s1082_s28  }
  0x23   :  { %s1085_s17 = smov [#allocation8]  }
  0x24   :  { %s59_s18 = sshll.u32 %s1085_s17, 4  ;;  %s60_s18 = int_to_ptr.vmem [resolvable:$true] %s59_s18 }
  0x25   :  { %s1040_s19 = scalar_lea.vmem %s60_s18, 2048  ;;  %p1045_p2 = scmp.lt.s32.totalorder %s60_s18, %s60_s18 }
  0x26   :  { %p1041_p1 = scmp.ne.s32.totalorder %s60_s18, %s1040_s19  ;;  %p1046_p3 = scmp.lt.s32.totalorder %s1040_s19, %s1040_s19 }
  0x28   :  { %p1047_p4 = por %p1046_p3, %p1045_p2 }
  0x2a   :  { %p1048_p5 = pnand %p1047_p4, %p1041_p1 }
  0x2c   :  { %1051 = shalt.err (!%p1048_p5)
}
  0x2d   :  { %65 = dma.hbm_to_vmem [thread:$0]  %s1218_s5, 2048, %s60_s18, [#allocation9], %s1081_s27, %s1081_s27, %s1082_s28  }
  0x2e   :  { %1072 = dma.done.wait [#allocation3], 896  }
  0x2f   :  { %1073 = vsyncadd [#allocation3], 4294966400 }
  0x30   :  { %1074 = dma.done.wait [#allocation6], 16384  }
  0x31   :  { %1075 = vsyncadd [#allocation6], 4294950912 }
  0x32   :  { %1076 = dma.done.wait [#allocation9], 2048  }
  0x33   :  { %1077 = vsyncadd [#allocation9], 4294965248  ;;  %v118_v0 = vld [vmem:[#allocation5 + $0xf8] sm:$0xff]  ;;  %v117_v2 = vld [vmem:[#allocation5 + $0xf0] sm:$0xff]  ;;  %vm1087_vm0 = vmmov 0   ;;  %s1088_s24 = smov [#allocation10]  }
  0x34   :  { %v102_v1 = vld [vmem:[#allocation5 + $0x78] sm:$0xff]  ;;  %702 = vmatprep.subr.mxu0 %v118_v0  ;;  %v101_v4 = vld [vmem:[#allocation5 + $0x70] sm:$0xff]  ;;  %v116_v6 = vld [vmem:[#allocation5 + $0xe8] sm:$0xff]  ;;  %s688_s25 = sshll.u32 %s1088_s24, 4  ;;  %s689_s25 = int_to_ptr.vmem [resolvable:$true] %s688_s25 }
  0x35   :  { %v150_v3 = vld [vmem:[#allocation5 + $0x1f8] sm:$0xff]  ;;  %703 = vmatpush3.msra.mxu0 %v102_v1  ;;  %v149_v7 = vld [vmem:[#allocation5 + $0x1f0] sm:$0xff]  ;;  %v100_v8 = vld [vmem:[#allocation5 + $0x68] sm:$0xff]  ;;  %p1057_p7 = scmp.lt.s32.totalorder %s689_s25, %s689_s25 }
  0x36   :  { %v134_v5 = vld [vmem:[#allocation5 + $0x178] sm:$0xff]  ;;  %737 = vmatprep.subr.mxu1 %v150_v3  ;;  %704 = vmatprep.subr.mxu0 %v117_v2  ;;  %v133_v9 = vld [vmem:[#allocation5 + $0x170] sm:$0xff]  ;;  %v148_v10 = vld [vmem:[#allocation5 + $0x1e8] sm:$0xff] }
  0x37   :  { %738 = vmatpush3.msra.mxu1 %v134_v5  ;;  %705 = vmatpush3.msra.mxu0 %v101_v4  ;;  %v115_v11 = vld [vmem:[#allocation5 + $0xe0] sm:$0xff]  ;;  %v132_v12 = vld [vmem:[#allocation5 + $0x168] sm:$0xff]  ;;  %v114_v15 = vld [vmem:[#allocation5 + $0xd8] sm:$0xff] }
  0x38   :  { %739 = vmatprep.subr.mxu1 %v149_v7  ;;  %706 = vmatprep.subr.mxu0 %v116_v6  ;;  %v99_v13 = vld [vmem:[#allocation5 + $0x60] sm:$0xff]  ;;  %v98_v17 = vld [vmem:[#allocation5 + $0x58] sm:$0xff]  ;;  %v113_v19 = vld [vmem:[#allocation5 + $0xd0] sm:$0xff] }
  0x39   :  { %740 = vmatpush3.msra.mxu1 %v133_v9  ;;  %v147_v14 = vld [vmem:[#allocation5 + $0x1e0] sm:$0xff]  ;;  %707 = vmatpush3.msra.mxu0 %v100_v8  ;;  %v146_v18 = vld [vmem:[#allocation5 + $0x1d8] sm:$0xff]  ;;  %v97_v21 = vld [vmem:[#allocation5 + $0x50] sm:$0xff] }
  0x3a   :  { %741 = vmatprep.subr.mxu1 %v148_v10  ;;  %v131_v16 = vld [vmem:[#allocation5 + $0x160] sm:$0xff]  ;;  %708 = vmatprep.subr.mxu0 %v115_v11  ;;  %v130_v20 = vld [vmem:[#allocation5 + $0x158] sm:$0xff]  ;;  %v145_v22 = vld [vmem:[#allocation5 + $0x1d0] sm:$0xff]  ;;  %v1086_v11 = vmov 0.0  }
  0x3b   :  { %742 = vmatpush3.msra.mxu1 %v132_v12  ;;  %709 = vmatpush3.msra.mxu0 %v99_v13  ;;  %v112_v23 = vld [vmem:[#allocation5 + $0xc8] sm:$0xff]  ;;  %v129_v24 = vld [vmem:[#allocation5 + $0x150] sm:$0xff]  ;;  %v111_v27 = vld [vmem:[#allocation5 + $0xc0] sm:$0xff] }
  0x3c   :  { %743 = vmatprep.subr.mxu1 %v147_v14  ;;  %710 = vmatprep.subr.mxu0 %v114_v15  ;;  %v96_v25 = vld [vmem:[#allocation5 + $0x48] sm:$0xff]  ;;  %v95_v29 = vld [vmem:[#allocation5 + $0x40] sm:$0xff]  ;;  %v110_v31 = vld [vmem:[#allocation5 + $0xb8] sm:$0xff] }
  0x3d   :  { %744 = vmatpush3.msra.mxu1 %v131_v16  ;;  %711 = vmatpush3.msra.mxu0 %v98_v17  ;;  %v144_v26 = vld [vmem:[#allocation5 + $0x1c8] sm:$0xff]  ;;  %v143_v30 = vld [vmem:[#allocation5 + $0x1c0] sm:$0xff]  ;;  %v94_v33 = vld [vmem:[#allocation5 + $0x38] sm:$0xff] }
  0x3e   :  { %745 = vmatprep.subr.mxu1 %v146_v18  ;;  %712 = vmatprep.subr.mxu0 %v113_v19  ;;  %v128_v28 = vld [vmem:[#allocation5 + $0x148] sm:$0xff]  ;;  %v127_v32 = vld [vmem:[#allocation5 + $0x140] sm:$0xff]  ;;  %v142_v34 = vld [vmem:[#allocation5 + $0x1b8] sm:$0xff] }
  0x3f   :  { %746 = vmatpush3.msra.mxu1 %v130_v20  ;;  %713 = vmatpush3.msra.mxu0 %v97_v21  ;;  %v109_v35 = vld [vmem:[#allocation5 + $0xb0] sm:$0xff]  ;;  %v126_v36 = vld [vmem:[#allocation5 + $0x138] sm:$0xff]  ;;  %v108_v39 = vld [vmem:[#allocation5 + $0xa8] sm:$0xff] }
  0x40   :  { %747 = vmatprep.subr.mxu1 %v145_v22  ;;  %714 = vmatprep.subr.mxu0 %v112_v23  ;;  %v93_v37 = vld [vmem:[#allocation5 + $0x30] sm:$0xff]  ;;  %v92_v41 = vld [vmem:[#allocation5 + $0x28] sm:$0xff]  ;;  %v107_v43 = vld [vmem:[#allocation5 + $0xa0] sm:$0xff] }
  0x41   :  { %748 = vmatpush3.msra.mxu1 %v129_v24  ;;  %715 = vmatpush3.msra.mxu0 %v96_v25  ;;  %v141_v38 = vld [vmem:[#allocation5 + $0x1b0] sm:$0xff]  ;;  %v140_v42 = vld [vmem:[#allocation5 + $0x1a8] sm:$0xff]  ;;  %v91_v45 = vld [vmem:[#allocation5 + $0x20] sm:$0xff] }
  0x42   :  { %749 = vmatprep.subr.mxu1 %v144_v26  ;;  %716 = vmatprep.subr.mxu0 %v111_v27  ;;  %v125_v40 = vld [vmem:[#allocation5 + $0x130] sm:$0xff]  ;;  %v124_v44 = vld [vmem:[#allocation5 + $0x128] sm:$0xff]  ;;  %v139_v46 = vld [vmem:[#allocation5 + $0x1a0] sm:$0xff] }
  0x43   :  { %750 = vmatpush3.msra.mxu1 %v128_v28  ;;  %717 = vmatpush3.msra.mxu0 %v95_v29  ;;  %v106_v47 = vld [vmem:[#allocation5 + $0x98] sm:$0xff]  ;;  %v123_v48 = vld [vmem:[#allocation5 + $0x120] sm:$0xff]  ;;  %v105_v51 = vld [vmem:[#allocation5 + $0x90] sm:$0xff] }
  0x44   :  { %751 = vmatprep.subr.mxu1 %v143_v30  ;;  %718 = vmatprep.subr.mxu0 %v110_v31  ;;  %v90_v49 = vld [vmem:[#allocation5 + $0x18] sm:$0xff]  ;;  %v89_v53 = vld [vmem:[#allocation5 + $0x10] sm:$0xff]  ;;  %v104_v55 = vld [vmem:[#allocation5 + $0x88] sm:$0xff] }
  0x45   :  { %752 = vmatpush3.msra.mxu1 %v127_v32  ;;  %719 = vmatpush3.msra.mxu0 %v94_v33  ;;  %v138_v50 = vld [vmem:[#allocation5 + $0x198] sm:$0xff]  ;;  %v137_v54 = vld [vmem:[#allocation5 + $0x190] sm:$0xff]  ;;  %v88_v57 = vld [vmem:[#allocation5 + $0x8] sm:$0xff] }
  0x46   :  { %753 = vmatprep.subr.mxu1 %v142_v34  ;;  %720 = vmatprep.subr.mxu0 %v109_v35  ;;  %v122_v52 = vld [vmem:[#allocation5 + $0x118] sm:$0xff]  ;;  %v121_v56 = vld [vmem:[#allocation5 + $0x110] sm:$0xff]  ;;  %v136_v58 = vld [vmem:[#allocation5 + $0x188] sm:$0xff] }
  0x47   :  { %754 = vmatpush3.msra.mxu1 %v126_v36  ;;  %721 = vmatpush3.msra.mxu0 %v93_v37  ;;  %v103_v59 = vld [vmem:[#allocation5 + $0x80] sm:$0xff]  ;;  %v81_v60 = vld [vmem:[#allocation2 + $0x8] sm:$0xff]  ;;  %v120_v62 = vld [vmem:[#allocation5 + $0x108] sm:$0xff] }
  0x48   :  { %755 = vmatprep.subr.mxu1 %v141_v38  ;;  %722 = vmatprep.subr.mxu0 %v108_v39  ;;  %v87_v61 = vld [vmem:[#allocation5] sm:$0xff]  ;;  %v80_v63 = vld [vmem:[#allocation2] sm:$0xff]  ;;  %v182_v1 = vld [vmem:[#allocation5 + $0x2f8] sm:$0xff] }
  0x49   :  { %756 = vmatpush3.msra.mxu1 %v125_v40  ;;  %723 = vmatpush3.msra.mxu0 %v92_v41  ;;  %v135_v0 = vld [vmem:[#allocation5 + $0x180] sm:$0xff]  ;;  %v166_v4 = vld [vmem:[#allocation5 + $0x278] sm:$0xff]  ;;  %v181_v6 = vld [vmem:[#allocation5 + $0x2f0] sm:$0xff] }
  0x4a   :  { %757 = vmatprep.subr.mxu1 %v140_v42  ;;  %724 = vmatprep.subr.mxu0 %v107_v43  ;;  %v119_v2 = vld [vmem:[#allocation5 + $0x100] sm:$0xff]  ;;  %v82_v5 = vld [vmem:[#allocation2 + $0x10] sm:$0xff]  ;;  %v165_v7 = vld [vmem:[#allocation5 + $0x270] sm:$0xff] }
  0x4b   :  { %758 = vmatpush3.msra.mxu1 %v124_v44  ;;  %725 = vmatpush3.msra.mxu0 %v91_v45  ;;  %v83_v3 = vld [vmem:[#allocation2 + $0x18] sm:$0xff]  ;;  %v180_v8 = vld [vmem:[#allocation5 + $0x2e8] sm:$0xff]  ;;  %v198_v9 = vld [vmem:[#allocation5 + $0x378] sm:$0xff] }
  0x4c   :  { %759 = vmatprep.subr.mxu1 %v139_v46  ;;  %726 = vmatprep.subr.mxu0 %v106_v47  ;;  %v164_v10 = vld [vmem:[#allocation5 + $0x268] sm:$0xff]  ;;  %v179_v12 = vld [vmem:[#allocation5 + $0x2e0] sm:$0xff]  ;;  %v197_v13 = vld [vmem:[#allocation5 + $0x370] sm:$0xff] }
  0x4d   :  { %760 = vmatpush3.msra.mxu1 %v123_v48  ;;  %727 = vmatpush3.msra.mxu0 %v90_v49  ;;  %v163_v14 = vld [vmem:[#allocation5 + $0x260] sm:$0xff]  ;;  %v178_v15 = vld [vmem:[#allocation5 + $0x2d8] sm:$0xff]  ;;  %v196_v16 = vld [vmem:[#allocation5 + $0x368] sm:$0xff] }
  0x4e   :  { %761 = vmatprep.subr.mxu1 %v138_v50  ;;  %728 = vmatprep.subr.mxu0 %v105_v51  ;;  %v162_v17 = vld [vmem:[#allocation5 + $0x258] sm:$0xff]  ;;  %v177_v18 = vld [vmem:[#allocation5 + $0x2d0] sm:$0xff]  ;;  %v195_v19 = vld [vmem:[#allocation5 + $0x360] sm:$0xff] }
  0x4f   :  { %762 = vmatpush3.msra.mxu1 %v122_v52  ;;  %729 = vmatpush3.msra.mxu0 %v89_v53  ;;  %v161_v20 = vld [vmem:[#allocation5 + $0x250] sm:$0xff]  ;;  %v176_v21 = vld [vmem:[#allocation5 + $0x2c8] sm:$0xff]  ;;  %v194_v22 = vld [vmem:[#allocation5 + $0x358] sm:$0xff] }
  0x50   :  { %763 = vmatprep.subr.mxu1 %v137_v54  ;;  %730 = vmatprep.subr.mxu0 %v104_v55  ;;  %v160_v23 = vld [vmem:[#allocation5 + $0x248] sm:$0xff]  ;;  %v175_v24 = vld [vmem:[#allocation5 + $0x2c0] sm:$0xff]  ;;  %v193_v25 = vld [vmem:[#allocation5 + $0x350] sm:$0xff] }
  0x51   :  { %764 = vmatpush3.msra.mxu1 %v121_v56  ;;  %731 = vmatpush3.msra.mxu0 %v88_v57  ;;  %v159_v26 = vld [vmem:[#allocation5 + $0x240] sm:$0xff]  ;;  %v174_v27 = vld [vmem:[#allocation5 + $0x2b8] sm:$0xff]  ;;  %v192_v28 = vld [vmem:[#allocation5 + $0x348] sm:$0xff] }
  0x52   :  { %765 = vmatprep.subr.mxu1 %v136_v58  ;;  %732 = vmatprep.subr.mxu0 %v103_v59  ;;  %v158_v29 = vld [vmem:[#allocation5 + $0x238] sm:$0xff]  ;;  %v173_v30 = vld [vmem:[#allocation5 + $0x2b0] sm:$0xff]  ;;  %v191_v31 = vld [vmem:[#allocation5 + $0x340] sm:$0xff] }
  0x53   :  { %270 = vmatprep.mubr.f32.mxu0 %v81_v60  ;;  %733 = vmatpush3.msra.mxu0 %v87_v61  ;;  %v157_v32 = vld [vmem:[#allocation5 + $0x230] sm:$0xff]  ;;  %v172_v33 = vld [vmem:[#allocation5 + $0x2a8] sm:$0xff]  ;;  %v190_v34 = vld [vmem:[#allocation5 + $0x338] sm:$0xff] }
  0x54   :  { %766 = vmatpush3.msra.mxu1 %v120_v62  ;;  %271 = vmatmul.mubr.f32.vlgmr.msra.gmra.mxu0 %v80_v63  ;;  %v156_v35 = vld [vmem:[#allocation5 + $0x228] sm:$0xff]  ;;  %v171_v36 = vld [vmem:[#allocation5 + $0x2a0] sm:$0xff]  ;;  %v189_v37 = vld [vmem:[#allocation5 + $0x330] sm:$0xff] }
  0x55   :  { %767 = vmatprep.subr.mxu1 %v135_v0  ;;  %772 = vmatprep.subr.mxu0 %v182_v1  ;;  %v155_v38 = vld [vmem:[#allocation5 + $0x220] sm:$0xff]  ;;  %v170_v39 = vld [vmem:[#allocation5 + $0x298] sm:$0xff]  ;;  %v188_v40 = vld [vmem:[#allocation5 + $0x328] sm:$0xff] }
  0x56   :  { %768 = vmatpush3.msra.mxu1 %v119_v2  ;;  %340 = vmatprep.mubr.f32.mxu1 %v83_v3  ;;  %v154_v41 = vld [vmem:[#allocation5 + $0x218] sm:$0xff]  ;;  %v169_v42 = vld [vmem:[#allocation5 + $0x290] sm:$0xff]  ;;  %v187_v43 = vld [vmem:[#allocation5 + $0x320] sm:$0xff] }
  0x57   :  { %773 = vmatpush3.msra.mxu0 %v166_v4  ;;  %341 = vmatmul.mubr.f32.vlgmr.msra.gmra.mxu1 %v82_v5  ;;  %v153_v44 = vld [vmem:[#allocation5 + $0x210] sm:$0xff]  ;;  %v168_v45 = vld [vmem:[#allocation5 + $0x288] sm:$0xff]  ;;  %v186_v46 = vld [vmem:[#allocation5 + $0x318] sm:$0xff] }
  0x58   :  { %774 = vmatprep.subr.mxu0 %v181_v6  ;;  %858 = vmatprep.subr.mxu1 %v1086_v11  ;;  %v152_v47 = vld [vmem:[#allocation5 + $0x208] sm:$0xff]  ;;  %v167_v48 = vld [vmem:[#allocation5 + $0x280] sm:$0xff]  ;;  %v85_v49 = vld [vmem:[#allocation2 + $0x28] sm:$0xff] }
  0x59   :  { %775 = vmatpush3.msra.mxu0 %v165_v7  ;;  %859 = vmatpush3.msra.mxu1 %v198_v9  ;;  %v151_v50 = vld [vmem:[#allocation5 + $0x200] sm:$0xff]  ;;  %v185_v51 = vld [vmem:[#allocation5 + $0x310] sm:$0xff]  ;;  %v84_v52 = vld [vmem:[#allocation2 + $0x20] sm:$0xff] }
  0x5a   :  { %776 = vmatprep.subr.mxu0 %v180_v8  ;;  %860 = vmatprep.subr.mxu1 %v1086_v11  ;;  %v184_v53 = vld [vmem:[#allocation5 + $0x308] sm:$0xff]  ;;  %v183_v54 = vld [vmem:[#allocation5 + $0x300] sm:$0xff]  ;;  %v86_v55 = vld [vmem:[#allocation2 + $0x30] sm:$0xff] }
  0x5b   :  { %777 = vmatpush3.msra.mxu0 %v164_v10  ;;  %861 = vmatpush3.msra.mxu1 %v197_v13  ;;  %v504_v56 = vld [vmem:[#allocation7 + $0x78] sm:$0xff]  ;;  %v503_v57 = vld [vmem:[#allocation7 + $0x70] sm:$0xff]  ;;  %v502_v58 = vld [vmem:[#allocation7 + $0x68] sm:$0xff] }
  0x5c   :  { %778 = vmatprep.subr.mxu0 %v179_v12  ;;  %862 = vmatprep.subr.mxu1 %v1086_v11  ;;  %v501_v59 = vld [vmem:[#allocation7 + $0x60] sm:$0xff]  ;;  %v500_v60 = vld [vmem:[#allocation7 + $0x58] sm:$0xff]  ;;  %v499_v61 = vld [vmem:[#allocation7 + $0x50] sm:$0xff] }
  0x5d   :  { %779 = vmatpush3.msra.mxu0 %v163_v14  ;;  %863 = vmatpush3.msra.mxu1 %v196_v16  ;;  %v498_v62 = vld [vmem:[#allocation7 + $0x48] sm:$0xff]  ;;  %v497_v63 = vld [vmem:[#allocation7 + $0x40] sm:$0xff]  ;;  %v496_v0 = vld [vmem:[#allocation7 + $0x38] sm:$0xff] }
  0x5e   :  { %780 = vmatprep.subr.mxu0 %v178_v15  ;;  %864 = vmatprep.subr.mxu1 %v1086_v11  ;;  %v495_v1 = vld [vmem:[#allocation7 + $0x30] sm:$0xff]  ;;  %v494_v2 = vld [vmem:[#allocation7 + $0x28] sm:$0xff]  ;;  %v493_v3 = vld [vmem:[#allocation7 + $0x20] sm:$0xff] }
  0x5f   :  { %781 = vmatpush3.msra.mxu0 %v162_v17  ;;  %865 = vmatpush3.msra.mxu1 %v195_v19  ;;  %v492_v4 = vld [vmem:[#allocation7 + $0x18] sm:$0xff]  ;;  %v491_v5 = vld [vmem:[#allocation7 + $0x10] sm:$0xff]  ;;  %v490_v6 = vld [vmem:[#allocation7 + $0x8] sm:$0xff] }
  0x60   :  { %782 = vmatprep.subr.mxu0 %v177_v18  ;;  %866 = vmatprep.subr.mxu1 %v1086_v11  ;;  %v489_v7 = vld [vmem:[#allocation7] sm:$0xff]  ;;  %v600_v8 = vld [vmem:[#allocation8 + $0x78] sm:$0xff]  ;;  %v599_v9 = vld [vmem:[#allocation8 + $0x70] sm:$0xff] }
  0x61   :  { %783 = vmatpush3.msra.mxu0 %v161_v20  ;;  %867 = vmatpush3.msra.mxu1 %v194_v22  ;;  %v598_v10 = vld [vmem:[#allocation8 + $0x68] sm:$0xff]  ;;  %v597_v12 = vld [vmem:[#allocation8 + $0x60] sm:$0xff]  ;;  %v596_v13 = vld [vmem:[#allocation8 + $0x58] sm:$0xff] }
  0x62   :  { %784 = vmatprep.subr.mxu0 %v176_v21  ;;  %868 = vmatprep.subr.mxu1 %v1086_v11  ;;  %v595_v14 = vld [vmem:[#allocation8 + $0x50] sm:$0xff]  ;;  %v594_v15 = vld [vmem:[#allocation8 + $0x48] sm:$0xff]  ;;  %v593_v16 = vld [vmem:[#allocation8 + $0x40] sm:$0xff] }
  0x63   :  { %785 = vmatpush3.msra.mxu0 %v160_v23  ;;  %869 = vmatpush3.msra.mxu1 %v193_v25  ;;  %v592_v17 = vld [vmem:[#allocation8 + $0x38] sm:$0xff]  ;;  %v591_v18 = vld [vmem:[#allocation8 + $0x30] sm:$0xff]  ;;  %v590_v19 = vld [vmem:[#allocation8 + $0x28] sm:$0xff] }
  0x64   :  { %786 = vmatprep.subr.mxu0 %v175_v24  ;;  %870 = vmatprep.subr.mxu1 %v1086_v11  ;;  %v589_v20 = vld [vmem:[#allocation8 + $0x20] sm:$0xff]  ;;  %v588_v21 = vld [vmem:[#allocation8 + $0x18] sm:$0xff] }
  0x65   :  { %787 = vmatpush3.msra.mxu0 %v159_v26  ;;  %871 = vmatpush3.msra.mxu1 %v192_v28  ;;  %v699_v26 = vld [vmem:[%s1215_s2] ss:$0 sm:$0xff] }
  0x66   :  { %788 = vmatprep.subr.mxu0 %v174_v27  ;;  %872 = vmatprep.subr.mxu1 %v1086_v11 }
  0x67   :  { %789 = vmatpush3.msra.mxu0 %v158_v29  ;;  %873 = vmatpush3.msra.mxu1 %v191_v31 }
  0x68   :  { %790 = vmatprep.subr.mxu0 %v173_v30  ;;  %874 = vmatprep.subr.mxu1 %v1086_v11 }
  0x69   :  { %791 = vmatpush3.msra.mxu0 %v157_v32  ;;  %875 = vmatpush3.msra.mxu1 %v190_v34 }
  0x6a   :  { %792 = vmatprep.subr.mxu0 %v172_v33  ;;  %876 = vmatprep.subr.mxu1 %v1086_v11 }
  0x6b   :  { %793 = vmatpush3.msra.mxu0 %v156_v35  ;;  %877 = vmatpush3.msra.mxu1 %v189_v37 }
  0x6c   :  { %794 = vmatprep.subr.mxu0 %v171_v36  ;;  %878 = vmatprep.subr.mxu1 %v1086_v11 }
  0x6d   :  { %795 = vmatpush3.msra.mxu0 %v155_v38  ;;  %879 = vmatpush3.msra.mxu1 %v188_v40  ;;  %v587_v40 = vld [vmem:[#allocation8 + $0x10] sm:$0xff] }
  0x6e   :  { %796 = vmatprep.subr.mxu0 %v170_v39  ;;  %880 = vmatprep.subr.mxu1 %v1086_v11 }
  0x6f   :  { %797 = vmatpush3.msra.mxu0 %v154_v41  ;;  %881 = vmatpush3.msra.mxu1 %v187_v43  ;;  %v586_v41 = vld [vmem:[#allocation8 + $0x8] sm:$0xff] }
  0x70   :  { %798 = vmatprep.subr.mxu0 %v169_v42  ;;  %882 = vmatprep.subr.mxu1 %v1086_v11  ;;  %v585_v42 = vld [vmem:[#allocation8] sm:$0xff]  ;;  %v700_v43 = vld [vmem:[%s1217_s4] ss:$0 sm:$0xff]  ;;  %s1052_s4 = scalar_lea.vmem %s689_s25, 128 }
  0x71   :  { %799 = vmatpush3.msra.mxu0 %v153_v44  ;;  %883 = vmatpush3.msra.mxu1 %v186_v46  ;;  %p1053_p6 = scmp.ne.s32.totalorder %s689_s25, %s1052_s4  ;;  %p1058_p8 = scmp.lt.s32.totalorder %s1052_s4, %s1052_s4 }
  0x72   :  { %800 = vmatprep.subr.mxu0 %v168_v45  ;;  %884 = vmatprep.subr.mxu1 %v1086_v11 }
  0x73   :  { %801 = vmatpush3.msra.mxu0 %v152_v47  ;;  %410 = vmatprep.mubr.f32.mxu0 %v85_v49  ;;  %v701_v49 = vld [vmem:[%s1219_s6] ss:$0 sm:$0xff]  ;;  %p1059_p9 = por %p1058_p8, %p1057_p7 }
  0x74   :  { %802 = vmatprep.subr.mxu0 %v167_v48  ;;  %885 = vmatpush3.msra.mxu1 %v185_v51 }
  0x75   :  { %803 = vmatpush3.msra.mxu0 %v151_v50  ;;  %886 = vmatprep.subr.mxu1 %v1086_v11  ;;  %p1060_p10 = pnand %p1059_p9, %p1053_p6 }
  0x76   :  { %411 = vmatmul.mubr.f32.vlgmr.msra.gmra.mxu0 %v84_v52  ;;  %887 = vmatpush3.msra.mxu1 %v184_v53 }
  0x77   :  { %890 = vmatprep.mubr.msk.f32.mxu1 %vm1087_vm0, %v1086_v11  ;;  %888 = vmatprep.subr.mxu1 %v1086_v11 }
  0x78   :  { %893 = vmatprep.subr.mxu0 %v1086_v11  ;;  %889 = vmatpush3.msra.mxu1 %v183_v54 }
  0x79   :  { %925 = vmatprep.mubr.msk.f32.mxu0 %vm1087_vm0, %v1086_v11  ;;  %891 = vmatmul.mubr.f32.vlgmr.msra.gmra.mxu1 %v86_v55 }
  0x7a   :  { %928 = vmatprep.subr.mxu1 %v1086_v11  ;;  %960 = vmatprep.mubr.msk.f32.mxu1 %vm1087_vm0, %v1086_v11 }
  0x7b   :  { %894 = vmatpush3.msra.mxu0 %v504_v56  ;;  %929 = vmatpush3.msra.mxu1 %v600_v8 }
  0x7c   :  { %895 = vmatprep.subr.mxu0 %v1086_v11  ;;  %930 = vmatprep.subr.mxu1 %v1086_v11 }
  0x7d   :  { %896 = vmatpush3.msra.mxu0 %v503_v57  ;;  %931 = vmatpush3.msra.mxu1 %v599_v9 }
  0x7e   :  { %897 = vmatprep.subr.mxu0 %v1086_v11  ;;  %932 = vmatprep.subr.mxu1 %v1086_v11 }
  0x7f   :  { %898 = vmatpush3.msra.mxu0 %v502_v58  ;;  %933 = vmatpush3.msra.mxu1 %v598_v10 }
  0x80   :  { %899 = vmatprep.subr.mxu0 %v1086_v11  ;;  %934 = vmatprep.subr.mxu1 %v1086_v11 }
  0x81   :  { %900 = vmatpush3.msra.mxu0 %v501_v59  ;;  %935 = vmatpush3.msra.mxu1 %v597_v12 }
  0x82   :  { %901 = vmatprep.subr.mxu0 %v1086_v11  ;;  %936 = vmatprep.subr.mxu1 %v1086_v11 }
  0x83   :  { %902 = vmatpush3.msra.mxu0 %v500_v60  ;;  %937 = vmatpush3.msra.mxu1 %v596_v13 }
  0x84   :  { %903 = vmatprep.subr.mxu0 %v1086_v11  ;;  %938 = vmatprep.subr.mxu1 %v1086_v11 }
  0x85   :  { %904 = vmatpush3.msra.mxu0 %v499_v61  ;;  %939 = vmatpush3.msra.mxu1 %v595_v14 }
  0x86   :  { %905 = vmatprep.subr.mxu0 %v1086_v11  ;;  %940 = vmatprep.subr.mxu1 %v1086_v11 }
  0x87   :  { %906 = vmatpush3.msra.mxu0 %v498_v62  ;;  %941 = vmatpush3.msra.mxu1 %v594_v15 }
  0x88   :  { %907 = vmatprep.subr.mxu0 %v1086_v11  ;;  %942 = vmatprep.subr.mxu1 %v1086_v11 }
  0x89   :  { %908 = vmatpush3.msra.mxu0 %v497_v63  ;;  %943 = vmatpush3.msra.mxu1 %v593_v16 }
  0x8a   :  { %909 = vmatprep.subr.mxu0 %v1086_v11  ;;  %944 = vmatprep.subr.mxu1 %v1086_v11 }
  0x8b   :  { %910 = vmatpush3.msra.mxu0 %v496_v0  ;;  %945 = vmatpush3.msra.mxu1 %v592_v17 }
  0x8c   :  { %911 = vmatprep.subr.mxu0 %v1086_v11  ;;  %946 = vmatprep.subr.mxu1 %v1086_v11 }
  0x8d   :  { %912 = vmatpush3.msra.mxu0 %v495_v1  ;;  %947 = vmatpush3.msra.mxu1 %v591_v18 }
  0x8e   :  { %913 = vmatprep.subr.mxu0 %v1086_v11  ;;  %948 = vmatprep.subr.mxu1 %v1086_v11 }
  0x8f   :  { %914 = vmatpush3.msra.mxu0 %v494_v2  ;;  %949 = vmatpush3.msra.mxu1 %v590_v19 }
  0x90   :  { %915 = vmatprep.subr.mxu0 %v1086_v11  ;;  %950 = vmatprep.subr.mxu1 %v1086_v11 }
  0x91   :  { %916 = vmatpush3.msra.mxu0 %v493_v3  ;;  %951 = vmatpush3.msra.mxu1 %v589_v20 }
  0x92   :  { %917 = vmatprep.subr.mxu0 %v1086_v11  ;;  %952 = vmatprep.subr.mxu1 %v1086_v11 }
  0x93   :  { %918 = vmatpush3.msra.mxu0 %v492_v4  ;;  %953 = vmatpush3.msra.mxu1 %v588_v21 }
  0x94   :  { %919 = vmatprep.subr.mxu0 %v1086_v11  ;;  %954 = vmatprep.subr.mxu1 %v1086_v11 }
  0x95   :  { %920 = vmatpush3.msra.mxu0 %v491_v5  ;;  %955 = vmatpush3.msra.mxu1 %v587_v40 }
  0x96   :  { %921 = vmatprep.subr.mxu0 %v1086_v11  ;;  %956 = vmatprep.subr.mxu1 %v1086_v11 }
  0x97   :  { %922 = vmatpush3.msra.mxu0 %v490_v6  ;;  %957 = vmatpush3.msra.mxu1 %v586_v41 }
  0x98   :  { %923 = vmatprep.subr.mxu0 %v1086_v11  ;;  %958 = vmatprep.subr.mxu1 %v1086_v11 }
  0x99   :  { %924 = vmatpush3.msra.mxu0 %v489_v7  ;;  %959 = vmatpush3.msra.mxu1 %v585_v42 }
 0x114   :  { %v734_v22 = vpop.f32.mrf.mxu0 }
 0x116   :  { %v735_v23 = vpop.f32.mrf.mxu0 }
 0x117   :  { %v769_v24 = vpop.f32.mrf.mxu1  ;;  %v736_v25 = vadd.f32 %v735_v23, %v734_v22 }
 0x119   :  { %v770_v27 = vpop.f32.mrf.mxu1  ;;  %v273_v28 = vadd.f32 %v736_v25, %v699_v26 }
 0x11a   :  { %v771_v29 = vadd.f32 %v770_v27, %v769_v24 }
 0x11c   :  { %v343_v32 = vadd.f32 %v771_v29, %v273_v28 }
 0x136   :  { %v804_v30 = vpop.f32.mrf.mxu0 }
 0x138   :  { %v805_v31 = vpop.f32.mrf.mxu0 }
 0x139   :  { %v806_v33 = vadd.f32 %v805_v31, %v804_v30  ;;  %v482_v34 = vpop.f32.mrf.mxu1 }
 0x13b   :  { %v413_v35 = vadd.f32 %v806_v33, %v343_v32  ;;  %v892_v36 = vpop.f32.mrf.mxu1 }
 0x13d   :  { %v483_v37 = vadd.f32 %v482_v34, %v413_v35 }
 0x13f   :  { %vm486_vm1 = vcmp.ge.f32.partialorder %v483_v37, 0.0  ;;  %v487_v38 = vmul.f32 0.2, %v483_v37 }
 0x141   :  { %v488_v39 = vsel %vm486_vm1, %v483_v37, %v487_v38 }
 0x142   :  { %926 = vmatmul.mubr.f32.vlgmr.msra.gmra.mxu0 %v488_v39 }
 0x202   :  { %v578_v44 = vpop.f32.mrf.mxu0 }
 0x203   :  { %v579_v45 = vadd.f32 %v700_v43, %v578_v44 }
 0x204   :  { %v927_v46 = vpop.f32.mrf.mxu0 }
 0x205   :  { %vm582_vm2 = vcmp.ge.f32.partialorder %v579_v45, 0.0  ;;  %v583_v47 = vmul.f32 0.2, %v579_v45 }
 0x207   :  { %v584_v48 = vsel %vm582_vm2, %v579_v45, %v583_v47 }
 0x208   :  { %961 = vmatmul.mubr.f32.vlgmr.msra.gmra.mxu1 %v584_v48 }
 0x2c8   :  { %v674_v50 = vpop.f32.mrf.mxu1 }
 0x2c9   :  { %v675_v51 = vadd.f32 %v701_v49, %v674_v50 }
 0x2ca   :  { %v962_v11 = vpop.f32.mrf.mxu1 }
 0x2cb   :  { %v679_v52 = vmul.f32 0.2, %v675_v51  ;;  %vm678_vm3 = vcmp.ge.f32.partialorder %v675_v51, 0.0 }
 0x2cd   :  { %v680_v53 = vsel %vm678_vm3, %v675_v51, %v679_v52 }
 0x2ce   :  { %681 = vst [vmem:[#allocation10] sm:$0xff] %v680_v53 }
 0x2cf   :  { %1063 = shalt.err (!%p1060_p10)
}
 0x2d0   :  { %691 = dma.vmem_to_hbm [thread:$0]  %s689_s25, 128, %s1220_s7, [#allocation4]  }
 0x2d1   :  { %1078 = dma.done.wait [#allocation4], 128  }
 0x2d2   :  { %1079 = vsyncadd [#allocation4], 4294967168 }
 0x2d3   :  { %695 = vsyncpa [#allocation3], 1 }
 0x2d4   :  { %696 = vsyncpa [#allocation6], 1 }
 0x2d5   :  { %697 = vsyncpa [#allocation9], 1 }
 0x2d6   :  { %698 = vsyncpa [#allocation4], 1 }

</bundles_post_ra>
